<compile_context>
chip_gen: v6e
topology: v6e:2x2x1
jax: 0.10.0
libtpu: 0.0.40
codegen_flags: <defaults>
</compile_context>

<pallas_src>
import jax
import jax.numpy as jnp
from jax.experimental import pallas as pl
from jax.experimental.pallas import tpu as pltpu


def _dpe_kernel(pos_ref, x_ref, o_ref):
    # pos_ref: (TS, TD)    x_ref / o_ref: (TB, TS, TD)
    o_ref[...] = (x_ref[...] + pos_ref[...][None, :, :]).astype(o_ref.dtype)


def dynamic_position_embedding(x, emb_weight, *, block_bytes=2 << 20):
    """x: (batch, seq_len, dim); emb_weight: (max_len, dim). Returns pos_emb + x."""
    batch, seq_len, dim = x.shape
    max_len, dim_e = emb_weight.shape
    assert dim == dim_e and seq_len <= max_len

    # Static tail slice of the table done in the wrapper: only seq_len rows
    # reach the kernel and there is no unaligned sublane slice inside it.
    # TODO(synk): for tiny-batch (decode-like) shapes, an element-offset
    # BlockSpec on the full table would avoid this extra HBM copy.
    pos = emb_weight[max_len - seq_len:]                      # (seq_len, dim)

    out_dtype = jnp.result_type(x.dtype, emb_weight.dtype)
    x_item = jnp.dtype(x.dtype).itemsize
    pos_item = jnp.dtype(pos.dtype).itemsize
    out_item = jnp.dtype(out_dtype).itemsize

    # ---------------- tile selection (lane-dense outputs) -------------------
    row_bytes = seq_len * dim * x_item            # one batch row of x
    ts, td = seq_len, dim
    if row_bytes > block_bytes:
        if dim % 128 == 0 and dim > 128:
            # Largest multiple-of-128 divisor of dim whose (seq_len, td) slab
            # fits the per-buffer budget.
            td = 128
            for cand in range(dim // 128, 0, -1):
                t = cand * 128
                if dim % t == 0 and seq_len * t * x_item <= block_bytes:
                    td = t
                    break
        elif seq_len > 8:
            # dim not lane-tileable: tile seq_len in sublane (8) multiples,
            # ragged last block is masked by Pallas.
            ts = (block_bytes // max(1, dim * x_item)) // 8 * 8
            ts = int(max(8, min(ts, seq_len)))

    # Batch tile: fill the per-buffer budget, ragged last block allowed.
    per_row = ts * td * x_item
    tb = int(max(1, min(batch, block_bytes // max(1, per_row))))

    n_d = pl.cdiv(dim, td)
    n_s = pl.cdiv(seq_len, ts)
    n_b = pl.cdiv(batch, tb)

    # Keep >=2 grid steps so v7x's two TensorCores both get work.
    if n_d * n_s * n_b == 1 and batch >= 2:
        tb = pl.cdiv(batch, 2)
        n_b = pl.cdiv(batch, tb)

    # Explicit scoped-VMEM budget: double-buffered blocks + headroom.
    footprint = 2 * (tb * ts * td * (x_item + out_item) + ts * td * pos_item)
    vmem_limit = int(min(max(footprint + (4 << 20), 16 << 20), 64 << 20))

    return pl.pallas_call(
        _dpe_kernel,
        out_shape=jax.ShapeDtypeStruct((batch, seq_len, dim), out_dtype),
        grid_spec=pltpu.PrefetchScalarGridSpec(
            num_scalar_prefetch=0,
            # dim outermost, batch innermost: pos block index is invariant
            # across the fast batch axis -> its DMA is issued once per (d, s).
            grid=(n_d, n_s, n_b),
            in_specs=[
                pl.BlockSpec((ts, td), lambda d, s, b: (s, d)),
                pl.BlockSpec((tb, ts, td), lambda d, s, b: (b, s, d)),
            ],
            out_specs=pl.BlockSpec((tb, ts, td), lambda d, s, b: (b, s, d)),
        ),
        compiler_params=pltpu.CompilerParams(
            dimension_semantics=("parallel", "parallel", "parallel"),
            vmem_limit_bytes=vmem_limit,
        ),
    )(pos, x)


if __name__ == "__main__":
    # Small shapes consistent with the module's forward.
    max_len, dim = 16, 128
    batch, seq_len = 4, 8

    key = jax.random.PRNGKey(0)
    k_emb, k_x = jax.random.split(key)

    # nn.Embedding default init is N(0, 1).
    emb_weight = jax.random.normal(k_emb, (max_len, dim), dtype=jnp.float32)
    x = jax.random.normal(k_x, (batch, seq_len, dim), dtype=jnp.float32)

    out = dynamic_position_embedding(x, emb_weight)
    out = jax.block_until_ready(out)

    # Reference check (plain JAX).
    ref = emb_weight[max_len - seq_len:][None, :, :] + x
    assert out.shape == (batch, seq_len, dim)
    assert out.dtype == ref.dtype
    assert jnp.allclose(out, ref, atol=1e-6), "mismatch vs reference"

    print("KERNEL_OK")
</pallas_src>

<mosaic_0001>
module attributes {stable_mosaic.version = 11 : i64} {
  func.func @_dpe_kernel(%arg0: i32, %arg1: i32, %arg2: i32, %arg3: memref<8x128xf32, #tpu.memory_space<vmem>>, %arg4: memref<2x8x128xf32, #tpu.memory_space<vmem>>, %arg5: memref<2x8x128xf32, #tpu.memory_space<vmem>>) attributes {dimension_semantics = [#tpu.dimension_semantics<parallel>, #tpu.dimension_semantics<parallel>, #tpu.dimension_semantics<parallel>], iteration_bounds = array<i64: 1, 1, 2>, scalar_prefetch = 0 : i64, scratch_operands = 0 : i64, tpu.core_type = #tpu.core_type<tc>, window_params = [{transform_indices = @transform_0, window_bounds = array<i64: 8, 128>}, {transform_indices = @transform_1, window_bounds = array<i64: 2, 8, 128>}, {transform_indices = @transform_2, window_bounds = array<i64: 2, 8, 128>}]} {
    %c0 = arith.constant 0 : index
    %c0_0 = arith.constant 0 : index
    %c0_1 = arith.constant 0 : index
    %0 = vector.load %arg4[%c0, %c0_0, %c0_1] : memref<2x8x128xf32, #tpu.memory_space<vmem>>, vector<2x8x128xf32>
    %c0_2 = arith.constant 0 : index
    %c0_3 = arith.constant 0 : index
    %1 = vector.load %arg3[%c0_2, %c0_3] : memref<8x128xf32, #tpu.memory_space<vmem>>, vector<8x128xf32>
    %2 = vector.shape_cast %1 : vector<8x128xf32> to vector<1x8x128xf32>
    %3 = vector.broadcast %2 : vector<1x8x128xf32> to vector<2x8x128xf32>
    %4 = arith.addf %0, %3 : vector<2x8x128xf32>
    %c0_4 = arith.constant 0 : index
    %c0_5 = arith.constant 0 : index
    %c0_6 = arith.constant 0 : index
    %5 = vector.load %arg5[%c0_4, %c0_5, %c0_6] : memref<2x8x128xf32, #tpu.memory_space<vmem>>, vector<2x8x128xf32>
    tpu.vector_store %arg5[%c0_4, %c0_5, %c0_6], %4 {strides = array<i32>} : memref<2x8x128xf32, #tpu.memory_space<vmem>>, vector<2x8x128xf32>,
    return
  }
  func.func @transform_0(%arg0: i32, %arg1: i32, %arg2: i32) -> (i32, i32) {
    %c0_i32 = arith.constant 0 : i32
    return %arg1, %arg0 : i32, i32
  }
  func.func @transform_1(%arg0: i32, %arg1: i32, %arg2: i32) -> (i32, i32, i32) {
    %c0_i32 = arith.constant 0 : i32
    return %arg2, %arg1, %arg0 : i32, i32, i32
  }
  func.func @transform_2(%arg0: i32, %arg1: i32, %arg2: i32) -> (i32, i32, i32) {
    %c0_i32 = arith.constant 0 : i32
    return %arg2, %arg1, %arg0 : i32, i32, i32
  }
}

</mosaic_0001>

<bundles_post_ra>
// kernel: tpu_custom_call.1
= control target key start
LH: loop header
LB: loop body
LE: loop exit
PB: predicated region body
PF: predicated region fallthrough
CT: control target
= control target key end

     0   :  { %7 = vsyncpa [#allocation3], 0  ;;  %s779_s0 = inlined_call_operand.hbm [shape: f32[8,128], index: 0, kind: input, shape index: {}]   ;;  %s780_s1 = inlined_call_operand.hbm [shape: f32[4,8,128], index: 1, kind: input, shape index: {}]   ;;  %s781_s2 = inlined_call_operand.hbm [shape: f32[4,8,128], index: 2, kind: output, shape index: {}]  }
   0x1   :  { %8 = vsyncpa [#allocation6], 0 }
   0x2   :  { %10 = vsyncpa [#allocation6 + $0x1], 0 }
   0x3   :  { %11 = vsyncpa [#allocation4], 0 }
   0x4   :  { %13 = vsyncpa [#allocation4 + $0x1], 0  ;;  %s602_s9 = smov 0   ;;  %s604_s10 = smov 0  }
   0x5   :  { %s606_s11 = smov 0   ;;  %s608_s12 = smov 0  }
   0x6   :  { %s610_s13 = smov 0   ;;  %s612_s14 = smov 0  }
   0x7 LB: > { %s344_s15 = sadd.s32 4294967295, %s578_s14   ;;  %s345_s16 = sadd.s32 4294967294, %s578_s14   ;;  %s578_s14 = sphi %s612_s14, %s19_s14   ;;  %s574_s13 = sphi %s610_s13, %s800_s13   ;;  %s570_s12 = sphi %s608_s12, %s799_s12   ;;  %s566_s11 = sphi %s606_s11, %s798_s11   ;;  %s562_s10 = sphi %s604_s10, %s797_s10   ;;  %s558_s9 = sphi %s602_s9, %s796_s9  }
   0x8   : > { %s77_s17 = sadd.s32 1, %s566_s11  ;;  %p84_p0 = scmp.ne.s32.totalorder %s566_s11, %s562_s10 }
   0x9   : > { %p85_p1 = scmp.eq.s32.totalorder %s578_s14, 0  ;;  %p90_p2 = scmp.ne.s32.totalorder %s562_s10, %s558_s9 }
   0xa   : > { %p640_p3 = scmp.eq.s32.totalorder %s344_s15, 0  ;;  %p118_p4 = scmp.eq.s32.totalorder %s344_s15, 1 }
   0xb   : > { %p644_p5 = por %p85_p1, %p84_p0  ;;  %p124_p6 = scmp.eq.s32.totalorder %s345_s16, 1 }
   0xc   : > { %p650_p7 = por %p640_p3, %p90_p2  ;;  %p654_p8 = por %p118_p4, %p84_p0 }
   0xd   : > { %p658_p9 = por %p124_p6, %p90_p2  ;;  %p346_p10 = scmp.ge.s32.totalorder %s578_s14, 1 }
   0xe   : > { %s786_s20 = scalar_select %p650_p7, 1, 0 }
   0xf   : > { %s787_s21 = scalar_select %p654_p8, 1, 0 }
  0x10   : > { %s788_s22 = scalar_select %p658_p9, 1, 0 }
  0x11   : > { %p131_p11 = scmp.lt.s32.totalorder %s578_s14, 3  ;;  %s580_s24 = smov [#allocation2]  }
  0x12   : > { %s147_s25 = sshll.u32 %s580_s24, 4  ;;  %p384_p1 = scmp.lt.s32.totalorder %s578_s14, 2  ;;  %s148_s25 = int_to_ptr.vmem [resolvable:$true] %s147_s25 }
  0x13   : > { %p665_p13 = pnand %p346_p10, %p131_p11  ;;  %s31_s28 = sadd.s32 1, %s574_s13 }
  0x14   : > { %p674_p4 = pnand %p384_p1, %p644_p5  ;;  %p32_p6 = scmp.ge.s32.totalorder %s31_s28, 2 }
  0x15   : > { %p371_p0 = pneg %p665_p13  ;;  %s158_s29 = sand.u32 1, %s566_s11  }
  0x16   : > { %s451_s30 = scalar_lea.vmem %s148_s25, 128  ;;  %p459_p8 = scmp.lt.s32.totalorder %s148_s25, %s148_s25 }
  0x17   : > { %p680_p2 = pnand %p371_p0, %p640_p3  ;;  %p452_p11 = scmp.ne.s32.totalorder %s148_s25, %s451_s30 }
  0x18   : > { %p460_p5 = scmp.lt.s32.totalorder %s451_s30, %s451_s30 }
  0x19   : > { %p442_p10 = pneg %p680_p2 }
  0x1a   : > { %p461_p1 = por %p460_p5, %p459_p8 }
  0x1b   : > { %p454_p12 = pnand %p452_p11, %p442_p10 }
  0x1d   : > { %p455_p9 = pneg %p454_p12 }
  0x1f   : > { %p462_p7 = pnand %p461_p1, %p455_p9 }
  0x21   : > { %465 = shalt.err (!%p462_p7)
}
  0x22   : > { %374 = dma.hbm_to_vmem [thread:$0]  (!%p680_p2), %s779_s0, 128, %s148_s25, [#allocation3]  }
  0x23   : > { %s802_s28 = smov (%p32_p6, %s31_s28), 0  ;;  %s349_s5 = sshll.u32 %s158_s29, 4 }
  0x24   : > { %s70_s6 = ssub.s32 %s574_s13, %s802_s28  ;;  %s361_s7 = sshll.u32 %s574_s13, 8 }
  0x25   : > { %p75_p12 = scmp.eq.s32.totalorder %s70_s6, 0  ;;  %s170_s16 = scalar_lea.hbm %s780_s1, %s361_s7 }
  0x26   : > { %s162_s19 = scalar_lea.vmem [#allocation5], %s349_s5  ;;  %s159_s30 = scalar_lea.sflag [#allocation6], %s158_s29 }
  0x27   : > { %s171_s24 = sshll.u32 %s162_s19, 4  ;;  %p468_p7 = pneg %p674_p4  ;;  %s172_s24 = int_to_ptr.vmem [resolvable:$true] %s171_s24 }
  0x28   : > { %s704_s27 = scalar_select %p75_p12, %s566_s11, %s77_s17  }
  0x29   : > { %s479_s25 = scalar_lea.vmem %s172_s24, 256  ;;  %s581_s3 = smov [#allocation5]  }
  0x2a   : > { %p480_p8 = scmp.ne.s32.totalorder %s172_s24, %s479_s25  ;;  %s484_s4 = sshll.u32 %s581_s3, 4  ;;  %s485_s4 = int_to_ptr.vmem [resolvable:$false] %s484_s4 }
  0x2b   : > { %s486_s6 = scalar_lea.vmem %s485_s4, 512  ;;  %p487_p2 = scmp.lt.s32.totalorder %s172_s24, %s485_s4 }
  0x2c   : > { %p482_p9 = pnand %p480_p8, %p468_p7  ;;  %p488_p6 = scmp.lt.s32.totalorder %s486_s6, %s479_s25 }
  0x2e   : > { %p483_p0 = pneg %p482_p9  ;;  %p489_p10 = por %p488_p6, %p487_p2 }
  0x30   : > { %p490_p11 = pnand %p489_p10, %p483_p0 }
  0x32   : > { %493 = shalt.err (!%p490_p11)
}
  0x33   : > { %s582_s5 = smov 128   ;;  %s583_s17 = smov 8  }
  0x34   : > { %378 = dma.hbm_to_vmem [thread:$0]  (!%p674_p4), %s170_s16, 256, %s172_s24, %s159_s30, %s582_s5, %s582_s5, %s583_s17  }
  0x35   : > { %183 = sbr.rel (%p665_p13) target bundleno = 89 (0x59), region = 28 }
  0x3a   : > { %545 = dma.done.wait (%p640_p3), [#allocation3], 128  }
  0x3b   : > { %547 = vsyncadd (%p640_p3), [#allocation3], 4294967168  ;;  %s717_s29 = sand.u32 1, %s562_s10   ;;  %p792_p5 = scmp.ne.s32.totalorder %s786_s20, 0 }
  0x3c   : > { %s354_s7 = sshll.u32 %s717_s29, 4  ;;  %s190_s8 = scalar_lea.sflag [#allocation6], %s717_s29 }
  0x3d   : > { %s193_s15 = scalar_lea.vmem [#allocation5], %s354_s7 }
  0x3e   : > { %549 = dma.done.wait (%p792_p5), %s190_s8, 256  }
  0x3f   : > { %551 = vsyncadd (%p792_p5), %s190_s8, 4294967040  ;;  %s213_s23 = scalar_lea.vmem [#allocation7], %s354_s7  ;;  %s362_s26 = sshll.u32 %s570_s12, 8  ;;  %v216_v0 = vld [vmem:[%s193_s15] sm:$0xff]  ;;  %v218_v1 = vld [vmem:[#allocation2] sm:$0xff] }
  0x40   : > { %s239_s18 = sshll.u32 %s213_s23, 4  ;;  %v217_v2 = vld [vmem:[%s193_s15 + $0x8] sm:$0xff]  ;;  %s731_s24 = scalar_lea.hbm %s781_s2, %s362_s26  ;;  %v219_v3 = vadd.f32 %v218_v1, %v216_v0  ;;  %s726_s18 = int_to_ptr.vmem [resolvable:$true] %s239_s18 }
  0x41   : > { %v220_v4 = vadd.f32 %v218_v1, %v217_v2  ;;  %s224_s20 = scalar_lea.sflag [#allocation4], %s717_s29  ;;  %s494_s30 = scalar_lea.vmem %s726_s18, 256 }
  0x42   : > { %221 = vst [vmem:[%s213_s23] sm:$0xff] %v219_v3  ;;  %p495_p3 = scmp.ne.s32.totalorder %s726_s18, %s494_s30  ;;  %p793_p13 = scmp.ne.s32.totalorder %s787_s21, 0 }
  0x43   : > { %222 = vst [vmem:[%s213_s23 + $0x8] sm:$0xff] %v220_v4  ;;  %s584_s12 = smov [#allocation7]  }
  0x44   : > { %p496_p4 = pnand %p495_p3, %p793_p13  ;;  %s498_s25 = sshll.u32 %s584_s12, 4  ;;  %s499_s25 = int_to_ptr.vmem [resolvable:$false] %s498_s25 }
  0x45   : > { %s500_s3 = scalar_lea.vmem %s499_s25, 512  ;;  %p501_p12 = scmp.lt.s32.totalorder %s726_s18, %s499_s25 }
  0x46   : > { %p497_p1 = pneg %p496_p4  ;;  %p502_p7 = scmp.lt.s32.totalorder %s500_s3, %s494_s30 }
  0x48   : > { %p503_p8 = por %p502_p7, %p501_p12 }
  0x4a   : > { %p504_p9 = pnand %p503_p8, %p497_p1 }
  0x4c   : > { %507 = shalt.err (!%p504_p9)
}
  0x4d   : > { %s508_s4 = scalar_lea.hbm %s731_s24, 256  ;;  %s512_s17 = scalar_lea.hbm %s781_s2, 512 }
  0x4e   : > { %p509_p0 = scmp.ne.s32.totalorder %s731_s24, %s508_s4  ;;  %p513_p10 = scmp.lt.s32.totalorder %s731_s24, %s781_s2 }
  0x4f   : > { %p514_p11 = scmp.lt.s32.totalorder %s512_s17, %s508_s4 }
  0x50   : > { %p510_p2 = pnand %p509_p0, %p793_p13 }
  0x51   : > { %p515_p5 = por %p514_p11, %p513_p10 }
  0x52   : > { %p511_p6 = pneg %p510_p2 }
  0x54   : > { %p516_p3 = pnand %p515_p5, %p511_p6 }
  0x56   : > { %519 = shalt.err (!%p516_p3)
}
  0x57   : > { %s585_s15 = smov 128   ;;  %s586_s23 = smov 8  }
  0x58   : > { %369 = dma.vmem_to_hbm [thread:$0]  (%p793_p13), %s726_s18, 256, %s731_s24, %s224_s20, %s585_s15, %s585_s15, %s586_s23  }
  0x59 PF: > { %s254_s26 = sand.u32 1, %s558_s9   ;;  %p794_p4 = scmp.ne.s32.totalorder %s788_s22, 0 }
  0x5a   : > { %p795_p1 = scmp.ge.s32.totalorder %s578_s14, 2  ;;  %s255_s16 = scalar_lea.sflag [#allocation4], %s254_s26 }
  0x5c   : > { %p380_p12 = pnand %p795_p1, %p794_p4 }
  0x5e   : > { %p381_p7 = pneg %p380_p12 }
  0x60   : > { %553 = dma.done.wait (%p381_p7), %s255_s16, 256  }
  0x61   : > { %555 = vsyncadd (%p381_p7), %s255_s16, 4294967040  ;;  %s19_s14 = sadd.s32 1, %s578_s14   ;;  %s796_s9 = smov %s562_s10 }
  0x62   : > { %p16_p8 = scmp.ge.s32.totalorder %s19_s14, 4   ;;  %s797_s10 = smov %s566_s11 }
  0x63   : > { %s798_s11 = smov %s704_s27  ;;  %s799_s12 = smov %s574_s13 }
  0x64   : > { %s800_s13 = smov %s802_s28  ;;  %18 = sbr.rel (!%p16_p8) target bundleno = 7 (0x7), region = 79 }
  0x69   :  { %260 = vsyncpa [#allocation3], 1 }
  0x6a   :  { %262 = vsyncpa [#allocation3 + $0x1], 1 }
  0x6b   :  { %263 = vsyncpa [#allocation6], 1 }
  0x6c   :  { %265 = vsyncpa [#allocation6 + $0x1], 1 }
  0x6d   :  { %266 = vsyncpa [#allocation4], 1 }
  0x6e   :  { %268 = vsyncpa [#allocation4 + $0x1], 1 }

</bundles_post_ra>
